<compile_context>
chip_gen: v5e
topology: v5e:2x2
jax: 0.10.0
libtpu: 0.0.40
codegen_flags: <defaults>
</compile_context>

<pallas_src>
import functools
import math

import jax
import jax.numpy as jnp
from jax.experimental import pallas as pl
from jax.experimental.pallas import tpu as pltpu


def _round_up(a, b):
    return (a + b - 1) // b * b


@functools.cache
def _single_buffer_weights_supported():
    """Capability probe: can grid-invariant inputs be single-buffered via
    pipeline_mode=pl.Buffered(1)?  One tiny cached compile; keeps the
    production kernel free of runtime try/except fallbacks."""
    if not hasattr(pl, "Buffered"):
        return False
    try:
        spec = pl.BlockSpec((8, 128), lambda i: (0, 0), pipeline_mode=pl.Buffered(1))
    except Exception:
        return False

    def _probe_kernel(x_ref, o_ref):
        o_ref[...] = x_ref[...] + 1.0

    try:
        with jax.ensure_compile_time_eval():
            fn = pl.pallas_call(
                _probe_kernel,
                out_shape=jax.ShapeDtypeStruct((16, 128), jnp.float32),
                grid=(2,),
                in_specs=[spec],
                out_specs=pl.BlockSpec((8, 128), lambda i: (i, 0)),
            )
            jax.block_until_ready(fn(jnp.zeros((8, 128), jnp.float32)))
        return True
    except Exception:
        return False


def _ista_kernel(x_ref, d_ref, dt_ref, d1t_ref, out_ref, *, lmbda, n_sub, mxu_dtype):
    """One row tile of the ISTA block.

    x_ref  : (TM, d_pad)   input rows (f32 or bf16)
    d_ref  : (d_pad, p_pad) D                       (mxu_dtype)
    dt_ref : (p_pad, d_pad) eta * D.T               (mxu_dtype)
    d1t_ref: (p_pad, d_pad) eta * D1.T              (mxu_dtype)
    out_ref: (TM, d_pad)   xhat rows

    The TM rows are processed as `n_sub` independent sub-tiles so the VPU
    relu/threshold/cast chain of one sub-tile overlaps the MXU matmuls of the
    other (LLO scheduler interleaves the independent chains).
    """
    D = d_ref[...]
    Dt = dt_ref[...]
    D1t = d1t_ref[...]

    tm = x_ref.shape[0]
    sub = tm // n_sub
    for s in range(n_sub):                      # static unroll; chains are independent
        rows = pl.ds(s * sub, sub)
        x = x_ref[rows, :]
        xf = x.astype(jnp.float32)              # f32 for the residual subtraction
        xm = x.astype(mxu_dtype)                # MXU operand

        # u = x @ D
        u = jnp.dot(xm, D, preferred_element_type=jnp.float32)          # (sub, p) f32
        # w1 = relu(u - lmbda)   (eta folded into Dt / D1t)
        w1 = jnp.maximum(u - lmbda, 0.0)

        # v = (eta * w1) @ D.T = w1 @ (eta * D.T)
        v = jnp.dot(w1.astype(mxu_dtype), Dt,
                    preferred_element_type=jnp.float32)                 # (sub, d) f32

        # g = (v - x) @ D
        r = (v - xf).astype(mxu_dtype)
        g = jnp.dot(r, D, preferred_element_type=jnp.float32)           # (sub, p) f32

        # w2 = relu(w1 - g - lmbda);  xhat = (eta * w2) @ D1.T = w2 @ (eta * D1.T)
        w2 = jnp.maximum(w1 - g - lmbda, 0.0)
        xhat = jnp.dot(w2.astype(mxu_dtype), D1t,
                       preferred_element_type=jnp.float32)              # (sub, d) f32
        out_ref[rows, :] = xhat.astype(out_ref.dtype)


def prepare_ista_weights(D, D1, *, eta=0.1, mxu_dtype=jnp.bfloat16):
    """Pad, eta-fold, cast and pre-transpose the weights ONCE per weight set.

    Returns (Db, Dt, D1t):
      Db  = pad(D)              shape (d_pad, p_pad)
      Dt  = pad(eta * D).T      shape (p_pad, d_pad)
      D1t = pad(eta * D1).T     shape (p_pad, d_pad)
    all in `mxu_dtype`.  Use mxu_dtype=jnp.float32 for a full-precision
    (parity) path at reduced MXU throughput.
    """
    if not eta > 0:
        raise ValueError("eta must be > 0 for the relu(eta*y) = eta*relu(y) folding.")
    d, p = D.shape
    assert D1.shape == (d, p)
    d_pad = _round_up(d, 128)
    p_pad = _round_up(p, 128)
    pad = ((0, d_pad - d), (0, p_pad - p))
    Df = jnp.pad(jnp.asarray(D, jnp.float32), pad)
    D1f = jnp.pad(jnp.asarray(D1, jnp.float32), pad)
    Db = Df.astype(mxu_dtype)
    Dt = (eta * Df).T.astype(mxu_dtype)
    D1t = (eta * D1f).T.astype(mxu_dtype)
    _single_buffer_weights_supported()     # warm the capability probe eagerly
    return Db, Dt, D1t


def _pick_tile(n_tokens, tile_m):
    # Multiple of 16 (bf16 rows pack 16/vreg); prefer >=2 grid steps so the
    # 'parallel' axis can shard across v7x's two TensorCores.
    tm = max(16, min(_round_up(tile_m, 16), _round_up(n_tokens, 16)))
    if _round_up(n_tokens, tm) // tm == 1 and tm >= 32:
        tm = _round_up(tm // 2, 16)
    n_pad = _round_up(n_tokens, tm)
    n_sub = 2 if (tm >= 64 and tm % 32 == 0) else 1
    return tm, n_pad, n_sub


def _vmem_limit_bytes(tm, d_pad, p_pad, n_sub, x_itemsize, mxu_itemsize, weight_buffers):
    sub = tm // n_sub
    need = (
        3 * d_pad * p_pad * mxu_itemsize * weight_buffers      # D, eta*D.T, eta*D1.T
        + 2 * tm * d_pad * x_itemsize * 2                      # double-buffered x & out tiles
        + n_sub * (2 * sub * p_pad * 4                         # f32 u/w1 and g
                   + sub * d_pad * 4                           # f32 v
                   + sub * (p_pad + d_pad) * mxu_itemsize)     # bf16 matmul-operand casts
    )
    try:
        info = pltpu.get_tpu_info()
        phys = int(getattr(info, "vmem_capacity_bytes", 64 << 20))
    except Exception:
        phys = 64 << 20                                        # safe on every generation
    limit = int(need * 1.4) + (8 << 20)                        # headroom for Mosaic scratch
    return max(32 << 20, min(limit, phys))


def overcomplete_ista_apply(x, Db, Dt, D1t, *, lmbda=0.1, tile_m=256,
                            mxu_dtype=jnp.bfloat16, vmem_limit_bytes=None):
    """Apply the ISTA block given weights from prepare_ista_weights.

    x: (n, l, d).  Jittable; no device syncs.
    tile_m guidance: v6e 256-512, v5e/v7x 128-256 (v7x has 64 MiB VMEM/TC).
    """
    n, l, d = x.shape
    d_pad, p_pad = Db.shape
    assert Dt.shape == (p_pad, d_pad) and D1t.shape == (p_pad, d_pad)
    N = n * l

    tm, n_pad, n_sub = _pick_tile(N, tile_m)

    x2 = x.reshape(N, d)
    if (n_pad, d_pad) != (N, d):
        x2 = jnp.pad(x2, ((0, n_pad - N), (0, d_pad - d)))

    single_buf = _single_buffer_weights_supported()
    if vmem_limit_bytes is None:
        vmem_limit_bytes = _vmem_limit_bytes(
            tm, d_pad, p_pad, n_sub,
            x_itemsize=jnp.dtype(x.dtype).itemsize,
            mxu_itemsize=jnp.dtype(mxu_dtype).itemsize,
            weight_buffers=1 if single_buf else 2)

    def _weight_spec(shape):
        if single_buf:
            # Grid-invariant weight: one resident VMEM copy, no double buffer.
            return pl.BlockSpec(shape, lambda i: (0, 0), pipeline_mode=pl.Buffered(1))
        return pl.BlockSpec(shape, lambda i: (0, 0))

    out = pl.pallas_call(
        functools.partial(_ista_kernel, lmbda=float(lmbda), n_sub=n_sub,
                          mxu_dtype=mxu_dtype),
        out_shape=jax.ShapeDtypeStruct((n_pad, d_pad), x.dtype),
        grid=(n_pad // tm,),
        in_specs=[
            pl.BlockSpec((tm, d_pad), lambda i: (i, 0)),     # x row tile
            _weight_spec((d_pad, p_pad)),                    # D
            _weight_spec((p_pad, d_pad)),                    # eta * D.T
            _weight_spec((p_pad, d_pad)),                    # eta * D1.T
        ],
        out_specs=pl.BlockSpec((tm, d_pad), lambda i: (i, 0)),
        compiler_params=pltpu.CompilerParams(
            dimension_semantics=("parallel",),
            vmem_limit_bytes=int(vmem_limit_bytes)),
    )(x2, Db, Dt, D1t)

    return out[:N, :d].reshape(n, l, d)


def overcomplete_ista_block(x, D, D1, *, eta=0.1, lmbda=0.1, tile_m=256,
                            mxu_dtype=jnp.bfloat16, vmem_limit_bytes=None):
    """Convenience wrapper (prepares weights per call).  For hot paths, call
    prepare_ista_weights once per weight set and reuse overcomplete_ista_apply."""
    Db, Dt, D1t = prepare_ista_weights(D, D1, eta=eta, mxu_dtype=mxu_dtype)
    return overcomplete_ista_apply(x, Db, Dt, D1t, lmbda=lmbda, tile_m=tile_m,
                                   mxu_dtype=mxu_dtype,
                                   vmem_limit_bytes=vmem_limit_bytes)


def _kaiming_uniform(key, shape, dtype=jnp.float32):
    # torch.nn.init.kaiming_uniform_ default: a=0, fan_in = shape[1], gain=sqrt(2)
    fan_in = shape[1]
    bound = math.sqrt(2.0) * math.sqrt(3.0 / fan_in)
    return jax.random.uniform(key, shape, dtype, minval=-bound, maxval=bound)


def _reference(x, D, D1, eta=0.1, lmbda=0.1):
    # f32 reference matching the PyTorch module (D, D1: (d, p); x: (n, l, d)).
    u = jnp.einsum('nld,dp->nlp', x, D)                # x @ D
    z1 = jax.nn.relu(eta * u - eta * lmbda)
    v = jnp.einsum('nlp,dp->nld', z1, D)               # z1 @ D.T
    g = jnp.einsum('nld,dp->nlp', v - x, D)            # (v - x) @ D
    z2 = jax.nn.relu(z1 - eta * g - eta * lmbda)
    return jnp.einsum('nlp,dp->nld', z2, D1)           # z2 @ D1.T


if __name__ == "__main__":
    eta, lmbda = 0.1, 0.1
    d, ratio = 32, 4
    p = ratio * d

    key = jax.random.PRNGKey(0)
    kx, kd, kd1, kx2 = jax.random.split(key, 4)
    D = _kaiming_uniform(kd, (d, p))
    D1 = _kaiming_uniform(kd1, (d, p))

    # Weight preprocessing (pad + eta-fold + bf16 + transpose) hoisted out: once per weight set.
    Db, Dt, D1t = prepare_ista_weights(D, D1, eta=eta)

    # Test 1: small canonical shape (single grid step, n_sub=1 path).
    n, l = 2, 8
    x = jax.random.normal(kx, (n, l, d), dtype=jnp.float32)
    apply_fn = jax.jit(functools.partial(overcomplete_ista_apply, lmbda=lmbda))
    out = jax.block_until_ready(apply_fn(x, Db, Dt, D1t))
    ref = _reference(x, D, D1, eta=eta, lmbda=lmbda)
    assert out.shape == (n, l, d)
    # bf16 MXU operands vs f32 reference -> loosened tolerances.
    assert jnp.allclose(out, ref, atol=2e-2, rtol=2e-2), "mismatch vs reference (test 1)"

    # Test 2: ragged token count, multi-step grid, 2-way intra-tile sub-tiling.
    n2, l2 = 2, 40                       # N = 80; tile_m=64 -> tm=64, 2 grid steps, n_sub=2
    xb = jax.random.normal(kx2, (n2, l2, d), dtype=jnp.float32)
    apply_fn2 = jax.jit(functools.partial(overcomplete_ista_apply, lmbda=lmbda, tile_m=64))
    out2 = jax.block_until_ready(apply_fn2(xb, Db, Dt, D1t))
    ref2 = _reference(xb, D, D1, eta=eta, lmbda=lmbda)
    assert out2.shape == (n2, l2, d)
    assert jnp.allclose(out2, ref2, atol=2e-2, rtol=2e-2), "mismatch vs reference (test 2)"

    print("KERNEL_OK")
</pallas_src>

<mosaic_0001>
module attributes {stable_mosaic.version = 11 : i64} {
  func.func @_probe_kernel(%arg0: i32, %arg1: memref<8x128xf32, #tpu.memory_space<vmem>>, %arg2: memref<8x128xf32, #tpu.memory_space<vmem>>) attributes {dimension_semantics = [#tpu.dimension_semantics<arbitrary>], iteration_bounds = array<i64: 2>, scalar_prefetch = 0 : i64, scratch_operands = 0 : i64, tpu.core_type = #tpu.core_type<tc>, window_params = [{pipeline_mode = #tpu.pipeline_mode<synchronous>, transform_indices = @transform_0, window_bounds = array<i64: 8, 128>}, {transform_indices = @transform_1, window_bounds = array<i64: 8, 128>}]} {
    %c0 = arith.constant 0 : index
    %c0_0 = arith.constant 0 : index
    %0 = vector.load %arg1[%c0, %c0_0] : memref<8x128xf32, #tpu.memory_space<vmem>>, vector<8x128xf32>
    %cst = arith.constant 1.000000e+00 : f32
    %1 = vector.broadcast %cst : f32 to vector<8x128xf32>
    %2 = arith.addf %0, %1 : vector<8x128xf32>
    %c0_1 = arith.constant 0 : index
    %c0_2 = arith.constant 0 : index
    %3 = vector.load %arg2[%c0_1, %c0_2] : memref<8x128xf32, #tpu.memory_space<vmem>>, vector<8x128xf32>
    tpu.vector_store %arg2[%c0_1, %c0_2], %2 {strides = array<i32>} : memref<8x128xf32, #tpu.memory_space<vmem>>, vector<8x128xf32>,
    return
  }
  func.func @transform_0(%arg0: i32) -> (i32, i32) {
    %c0_i32 = arith.constant 0 : i32
    %c0_i32_0 = arith.constant 0 : i32
    %c0_i32_1 = arith.constant 0 : i32
    return %c0_i32, %c0_i32_0 : i32, i32
  }
  func.func @transform_1(%arg0: i32) -> (i32, i32) {
    %c0_i32 = arith.constant 0 : i32
    %c0_i32_0 = arith.constant 0 : i32
    return %arg0, %c0_i32 : i32, i32
  }
}

module attributes {stable_mosaic.version = 11 : i64} {
  func.func @_ista_kernel(%arg0: i32, %arg1: memref<16x128xf32, #tpu.memory_space<vmem>>, %arg2: memref<128x128xbf16, #tpu.memory_space<vmem>>, %arg3: memref<128x128xbf16, #tpu.memory_space<vmem>>, %arg4: memref<128x128xbf16, #tpu.memory_space<vmem>>, %arg5: memref<16x128xf32, #tpu.memory_space<vmem>>) attributes {dimension_semantics = [#tpu.dimension_semantics<parallel>], iteration_bounds = array<i64: 1>, scalar_prefetch = 0 : i64, scratch_operands = 0 : i64, tpu.core_type = #tpu.core_type<tc>, window_params = [{transform_indices = @transform_0, window_bounds = array<i64: 16, 128>}, {pipeline_mode = #tpu.pipeline_mode<synchronous>, transform_indices = @transform_1, window_bounds = array<i64: 128, 128>}, {pipeline_mode = #tpu.pipeline_mode<synchronous>, transform_indices = @transform_2, window_bounds = array<i64: 128, 128>}, {pipeline_mode = #tpu.pipeline_mode<synchronous>, transform_indices = @transform_3, window_bounds = array<i64: 128, 128>}, {transform_indices = @transform_4, window_bounds = array<i64: 16, 128>}]} {
    %c0 = arith.constant 0 : index
    %c0_0 = arith.constant 0 : index
    %0 = vector.load %arg2[%c0, %c0_0] : memref<128x128xbf16, #tpu.memory_space<vmem>>, vector<128x128xbf16>
    %c0_1 = arith.constant 0 : index
    %c0_2 = arith.constant 0 : index
    %1 = vector.load %arg3[%c0_1, %c0_2] : memref<128x128xbf16, #tpu.memory_space<vmem>>, vector<128x128xbf16>
    %c0_3 = arith.constant 0 : index
    %c0_4 = arith.constant 0 : index
    %2 = vector.load %arg4[%c0_3, %c0_4] : memref<128x128xbf16, #tpu.memory_space<vmem>>, vector<128x128xbf16>
    %c0_5 = arith.constant 0 : index
    %c0_6 = arith.constant 0 : index
    %3 = vector.load %arg1[%c0_5, %c0_6] : memref<16x128xf32, #tpu.memory_space<vmem>>, vector<16x128xf32>
    %4 = arith.truncf %3 : vector<16x128xf32> to vector<16x128xbf16>
    %cst = arith.constant dense<0.000000e+00> : vector<16x128xf32>
    %5 = tpu.matmul %4, %0, %cst {dimension_numbers = #tpu.dot_dimension_numbers<[1], [0], [0], [1], [0, 0, 1, 1], [], []>} : vector<16x128xbf16>, vector<128x128xbf16>, vector<16x128xf32> -> vector<16x128xf32>
    %cst_7 = arith.constant 1.000000e-01 : f32
    %6 = vector.broadcast %cst_7 : f32 to vector<16x128xf32>
    %7 = arith.subf %5, %6 : vector<16x128xf32>
    %cst_8 = arith.constant 0.000000e+00 : f32
    %8 = vector.broadcast %cst_8 : f32 to vector<16x128xf32>
    %9 = arith.maximumf %7, %8 : vector<16x128xf32>
    %10 = arith.truncf %9 : vector<16x128xf32> to vector<16x128xbf16>
    %cst_9 = arith.constant dense<0.000000e+00> : vector<16x128xf32>
    %11 = tpu.matmul %10, %1, %cst_9 {dimension_numbers = #tpu.dot_dimension_numbers<[1], [0], [0], [1], [0, 0, 1, 1], [], []>} : vector<16x128xbf16>, vector<128x128xbf16>, vector<16x128xf32> -> vector<16x128xf32>
    %12 = arith.subf %11, %3 : vector<16x128xf32>
    %13 = arith.truncf %12 : vector<16x128xf32> to vector<16x128xbf16>
    %cst_10 = arith.constant dense<0.000000e+00> : vector<16x128xf32>
    %14 = tpu.matmul %13, %0, %cst_10 {dimension_numbers = #tpu.dot_dimension_numbers<[1], [0], [0], [1], [0, 0, 1, 1], [], []>} : vector<16x128xbf16>, vector<128x128xbf16>, vector<16x128xf32> -> vector<16x128xf32>
    %15 = arith.subf %9, %14 : vector<16x128xf32>
    %cst_11 = arith.constant 1.000000e-01 : f32
    %16 = vector.broadcast %cst_11 : f32 to vector<16x128xf32>
    %17 = arith.subf %15, %16 : vector<16x128xf32>
    %cst_12 = arith.constant 0.000000e+00 : f32
    %18 = vector.broadcast %cst_12 : f32 to vector<16x128xf32>
    %19 = arith.maximumf %17, %18 : vector<16x128xf32>
    %20 = arith.truncf %19 : vector<16x128xf32> to vector<16x128xbf16>
    %cst_13 = arith.constant dense<0.000000e+00> : vector<16x128xf32>
    %21 = tpu.matmul %20, %2, %cst_13 {dimension_numbers = #tpu.dot_dimension_numbers<[1], [0], [0], [1], [0, 0, 1, 1], [], []>} : vector<16x128xbf16>, vector<128x128xbf16>, vector<16x128xf32> -> vector<16x128xf32>
    %c0_14 = arith.constant 0 : index
    %c0_15 = arith.constant 0 : index
    %22 = vector.load %arg5[%c0_14, %c0_15] : memref<16x128xf32, #tpu.memory_space<vmem>>, vector<16x128xf32>
    tpu.vector_store %arg5[%c0_14, %c0_15], %21 {strides = array<i32>} : memref<16x128xf32, #tpu.memory_space<vmem>>, vector<16x128xf32>,
    return
  }
  func.func @transform_0(%arg0: i32) -> (i32, i32) {
    %c0_i32 = arith.constant 0 : i32
    %c0_i32_0 = arith.constant 0 : i32
    return %arg0, %c0_i32 : i32, i32
  }
  func.func @transform_1(%arg0: i32) -> (i32, i32) {
    %c0_i32 = arith.constant 0 : i32
    %c0_i32_0 = arith.constant 0 : i32
    %c0_i32_1 = arith.constant 0 : i32
    return %c0_i32, %c0_i32_0 : i32, i32
  }
  func.func @transform_2(%arg0: i32) -> (i32, i32) {
    %c0_i32 = arith.constant 0 : i32
    %c0_i32_0 = arith.constant 0 : i32
    %c0_i32_1 = arith.constant 0 : i32
    return %c0_i32, %c0_i32_0 : i32, i32
  }
  func.func @transform_3(%arg0: i32) -> (i32, i32) {
    %c0_i32 = arith.constant 0 : i32
    %c0_i32_0 = arith.constant 0 : i32
    %c0_i32_1 = arith.constant 0 : i32
    return %c0_i32, %c0_i32_0 : i32, i32
  }
  func.func @transform_4(%arg0: i32) -> (i32, i32) {
    %c0_i32 = arith.constant 0 : i32
    %c0_i32_0 = arith.constant 0 : i32
    return %arg0, %c0_i32 : i32, i32
  }
}

</mosaic_0001>

<bundles_post_ra>
// kernel: tpu_custom_call.1
= control target key start
LH: loop header
LB: loop body
LE: loop exit
PB: predicated region body
PF: predicated region fallthrough
CT: control target
= control target key end

     0   :  { %6 = vsyncpa [#allocation3], 0  ;;  %s441_s0 = inlined_call_operand.hbm [shape: f32[8,128], index: 0, kind: input, shape index: {}]   ;;  %s442_s1 = inlined_call_operand.hbm [shape: f32[16,128], index: 1, kind: output, shape index: {}]  }
   0x1   :  { %7 = vsyncpa [#allocation4], 0 }
   0x2   :  { %9 = vsyncpa [#allocation4 + $0x1], 0  ;;  %s357_s6 = smov 0   ;;  %s359_s7 = smov 0  }
   0x3   :  { %s361_s8 = smov 0   ;;  %s363_s9 = smov 0  }
   0x4 LB: > { %s378_s10 = sadd.s32 4294967295, %s344_s9   ;;  %s188_s11 = sadd.s32 4294967294, %s344_s9   ;;  %s344_s9 = sphi %s363_s9, %s448_s9   ;;  %s340_s8 = sphi %s361_s8, %s447_s8   ;;  %s336_s7 = sphi %s359_s7, %s446_s7   ;;  %s332_s6 = sphi %s357_s6, %s445_s6  }
   0x5   : > { %s382_s12 = sadd.s32 1, %s344_s9   ;;  %s43_s13 = sadd.s32 1, %s340_s8 }
   0x6   : > { %s40_s14 = ssub.s32 %s344_s9, %s382_s12  ;;  %p53_p0 = scmp.ne.s32.totalorder %s340_s8, %s336_s7 }
   0x7   : > { %p41_p1 = scmp.eq.s32.totalorder %s40_s14, 0  ;;  %p54_p2 = scmp.eq.s32.totalorder %s378_s10, 1 }
   0x8   : > { %p59_p3 = scmp.ne.s32.totalorder %s336_s7, %s332_s6  ;;  %p60_p4 = scmp.eq.s32.totalorder %s188_s11, 1 }
   0x9   : > { %s393_s15 = scalar_select %p41_p1, %s340_s8, %s43_s13  }
   0xa   : > { %p395_p5 = por %p54_p2, %p53_p0  ;;  %p399_p6 = por %p60_p4, %p59_p3 }
   0xb   : > { %p189_p7 = scmp.ge.s32.totalorder %s344_s9, 1  ;;  %p67_p8 = scmp.lt.s32.totalorder %s344_s9, 3 }
   0xc   : > { %p212_p9 = scmp.eq.s32.totalorder %s378_s10, 0  ;;  %s79_s20 = sshll.u32 %s441_s0, 4  ;;  %s80_s20 = int_to_ptr.hbm [resolvable:$true] %s79_s20 }
   0xd   : > { %p68_p10 = pnand %p189_p7, %p67_p8  ;;  %s346_s21 = smov [#allocation2]  }
   0xe   : > { %s81_s22 = sshll.u32 %s346_s21, 4  ;;  %s82_s22 = int_to_ptr.vmem [resolvable:$true] %s81_s22 }
   0xf   : > { %p204_p11 = pneg %p68_p10  ;;  %94 = sbr.rel (%p68_p10) target bundleno = 37 (0x25), region = 24 }
  0x11   : > { %p205_p12 = pnand %p212_p9, %p204_p11 }
  0x13   : > { %207 = dma.hbm_to_vmem [thread:$0]  (!%p205_p12), %s80_s20, 128, %s82_s22, [#allocation3]  }
  0x14   : > { %323 = dma.done.wait (%p212_p9), [#allocation3], 128  }
  0x15   : > { %325 = vsyncadd (%p212_p9), [#allocation3], 4294967168  ;;  %s107_s23 = sand.u32 1, %s336_s7   ;;  %s195_s24 = sshll.u32 %s378_s10, 3  ;;  %v110_v0 = vld [vmem:[#allocation2] sm:$0xff] }
  0x16   : > { %s193_s25 = sshll.u32 %s107_s23, 3  ;;  %s124_s28 = scalar_lea.hbm %s442_s1, %s195_s24  ;;  %v111_v1 = vadd.f32 1.0, %v110_v0 }
  0x17   : > { %s109_s29 = scalar_lea.vmem [#allocation5], %s193_s25  ;;  %s128_s2 = sshll.u32 %s124_s28, 4  ;;  %s129_s2 = int_to_ptr.hbm [resolvable:$true] %s128_s2 }
  0x18   : > { %s126_s30 = sshll.u32 %s109_s29, 4  ;;  %112 = vst [vmem:[%s109_s29] sm:$0xff] %v111_v1  ;;  %s114_s3 = scalar_lea.sflag [#allocation4], %s107_s23  ;;  %s127_s30 = int_to_ptr.vmem [resolvable:$true] %s126_s30 }
  0x19   : > { %s292_s4 = sshra.s32 %s129_s2, 4  ;;  %s298_s13 = scalar_lea.hbm %s442_s1, 16  ;;  %s293_s4 = int_to_ptr.hbm [resolvable:$true] %s292_s4 }
  0x1a   : > { %s294_s5 = scalar_lea.hbm %s293_s4, 8  ;;  %p299_p2 = scmp.lt.s32.totalorder %s293_s4, %s442_s1 }
  0x1b   : > { %p295_p13 = scmp.ne.s32.totalorder %s293_s4, %s294_s5  ;;  %p300_p3 = scmp.lt.s32.totalorder %s298_s13, %s294_s5 }
  0x1d   : > { %p296_p0 = pnand %p295_p13, %p395_p5  ;;  %p301_p4 = por %p300_p3, %p299_p2 }
  0x1f   : > { %p297_p1 = pneg %p296_p0 }
  0x21   : > { %p302_p7 = pnand %p301_p4, %p297_p1 }
  0x23   : > { %305 = shalt.err (!%p302_p7)
}
  0x24   : > { %202 = dma.vmem_to_hbm [thread:$0]  (%p395_p5), %s127_s30, 128, %s129_s2, %s114_s3  }
  0x25 PF: > { %p214_p8 = scmp.ge.s32.totalorder %s344_s9, 2  ;;  %s140_s19 = sand.u32 1, %s332_s6  }
  0x26   : > { %s141_s20 = scalar_lea.sflag [#allocation4], %s140_s19 }
  0x27   : > { %p209_p9 = pnand %p214_p8, %p399_p6 }
  0x29   : > { %p210_p10 = pneg %p209_p9 }
  0x2b   : > { %327 = dma.done.wait (%p210_p10), %s141_s20, 128  }
  0x2c   : > { %329 = vsyncadd (%p210_p10), %s141_s20, 4294967168  ;;  %p12_p11 = scmp.ge.s32.totalorder %s382_s12, 4   ;;  %s445_s6 = smov %s336_s7 }
  0x2d   : > { %s446_s7 = smov %s340_s8  ;;  %s447_s8 = smov %s393_s15 }
  0x2e   : > { %s448_s9 = smov %s382_s12  ;;  %14 = sbr.rel (!%p12_p11) target bundleno = 4 (0x4), region = 61 }
  0x33   :  { %147 = vsyncpa [#allocation3], 1 }
  0x34   :  { %149 = vsyncpa [#allocation3 + $0x1], 1 }
  0x35   :  { %150 = vsyncpa [#allocation4], 1 }
  0x36   :  { %152 = vsyncpa [#allocation4 + $0x1], 1 }

// kernel: overcomplete_ista_apply.1
= control target key start
LH: loop header
LB: loop body
LE: loop exit
PB: predicated region body
PF: predicated region fallthrough
CT: control target
= control target key end

     0   :  { %9 = vsyncpa [#allocation3], 0  ;;  %s594_s0 = inlined_call_operand.vmem [shape: f32[16,128], index: 0, kind: input, shape index: {}]   ;;  %s595_s1 = inlined_call_operand.hbm [shape: bf16[128,128], index: 1, kind: input, shape index: {}]   ;;  %s596_s2 = inlined_call_operand.hbm [shape: bf16[128,128], index: 2, kind: input, shape index: {}]   ;;  %s597_s3 = inlined_call_operand.hbm [shape: bf16[128,128], index: 3, kind: input, shape index: {}]   ;;  %s598_s4 = inlined_call_operand.vmem [shape: f32[16,128], index: 4, kind: output, shape index: {}]  }
   0x1   :  { %10 = vsyncpa [#allocation5], 0  ;;  %s30_s17 = sshll.u32 %s596_s2, 4  ;;  %s543_s18 = smov [#allocation4]   ;;  %s31_s17 = int_to_ptr.hbm [resolvable:$true] %s30_s17 }
   0x2   :  { %s32_s19 = sshll.u32 %s543_s18, 4  ;;  %s17_s22 = sshll.u32 %s595_s1, 4  ;;  %s33_s19 = int_to_ptr.vmem [resolvable:$true] %s32_s19  ;;  %s18_s22 = int_to_ptr.hbm [resolvable:$true] %s17_s22 }
   0x3   :  { %s544_s23 = smov 64   ;;  %s545_s24 = smov 4  }
   0x4   :  { %38 = dma.hbm_to_vmem [thread:$0]  %s31_s17, 1024, %s33_s19, [#allocation5], %s544_s23, %s544_s23, %s545_s24  }
   0x5   :  { %s546_s25 = smov [#allocation2]   ;;  %s43_s29 = sshll.u32 %s597_s3, 4  ;;  %s44_s29 = int_to_ptr.hbm [resolvable:$true] %s43_s29 }
   0x6   :  { %s19_s26 = sshll.u32 %s546_s25, 4  ;;  %s547_s2 = smov [#allocation6]   ;;  %s20_s26 = int_to_ptr.vmem [resolvable:$true] %s19_s26 }
   0x7   :  { %25 = dma.hbm_to_vmem [thread:$0]  %s18_s22, 1024, %s20_s26, [#allocation3], %s544_s23, %s544_s23, %s545_s24  }
   0x8   :  { %s45_s30 = sshll.u32 %s547_s2, 4  ;;  %s46_s30 = int_to_ptr.vmem [resolvable:$true] %s45_s30 }
   0x9   :  { %51 = dma.hbm_to_vmem [thread:$0]  %s44_s29, 1024, %s46_s30, [#allocation5], %s544_s23, %s544_s23, %s545_s24  }
   0xa   :  { %539 = dma.done.wait [#allocation3], 1024  }
   0xb   :  { %540 = vsyncadd [#allocation3], 4294966272 }
   0xc   :  { %541 = dma.done.wait [#allocation5], 2048  }
   0xd   :  { %542 = vsyncadd [#allocation5], 4294965248  ;;  %v445_v0 = vld [vmem:[#allocation2 + $0x38] sm:$0xff]  ;;  %v444_v1 = vld [vmem:[#allocation2 + $0x30] sm:$0xff] }
   0xe   :  { %163 = vmatpush.bf16.msra.mxu0 %v445_v0  ;;  %247 = vmatpush.bf16.msra.mxu2 %v445_v0  ;;  %v453_v2 = vld [vmem:[#allocation4 + $0x38] sm:$0xff]  ;;  %v452_v3 = vld [vmem:[#allocation4 + $0x30] sm:$0xff]  ;;  %v443_v4 = vld [vmem:[#allocation2 + $0x28] sm:$0xff] }
   0xf   :  { %230 = vmatpush.bf16.msra.mxu1 %v453_v2  ;;  %v451_v5 = vld [vmem:[#allocation4 + $0x28] sm:$0xff]  ;;  %v442_v6 = vld [vmem:[#allocation2 + $0x20] sm:$0xff]  ;;  %v441_v8 = vld [vmem:[#allocation2 + $0x18] sm:$0xff] }
  0x10   :  { %v450_v7 = vld [vmem:[#allocation4 + $0x20] sm:$0xff]  ;;  %v440_v9 = vld [vmem:[#allocation2 + $0x10] sm:$0xff]  ;;  %v439_v10 = vld [vmem:[#allocation2 + $0x8] sm:$0xff] }
  0x11   :  { %v438_v11 = vld [vmem:[#allocation2] sm:$0xff]  ;;  %v113_v13 = vld [vmem:[%s594_s0 + $0x8] sm:$0xff]  ;;  %v449_v15 = vld [vmem:[#allocation4 + $0x18] sm:$0xff] }
  0x12   :  { %164 = vmatpush.bf16.msra.mxu0 %v444_v1  ;;  %248 = vmatpush.bf16.msra.mxu2 %v444_v1  ;;  %v112_v12 = vld [vmem:[%s594_s0] sm:$0xff]  ;;  %v448_v16 = vld [vmem:[#allocation4 + $0x10] sm:$0xff]  ;;  %v447_v17 = vld [vmem:[#allocation4 + $0x8] sm:$0xff] }
  0x13   :  { %231 = vmatpush.bf16.msra.mxu1 %v452_v3  ;;  %v114_v14 = vpack.c.bf16 %v113_v13, %v112_v12  ;;  %v446_v18 = vld [vmem:[#allocation4] sm:$0xff]  ;;  %v461_v26 = vld [vmem:[#allocation6 + $0x38] sm:$0xff]  ;;  %v460_v27 = vld [vmem:[#allocation6 + $0x30] sm:$0xff] }
  0x14   :  { %316 = vmatpush.bf16.msra.mxu3 %v461_v26  ;;  %v459_v28 = vld [vmem:[#allocation6 + $0x28] sm:$0xff]  ;;  %v458_v29 = vld [vmem:[#allocation6 + $0x20] sm:$0xff]  ;;  %v457_v35 = vld [vmem:[#allocation6 + $0x18] sm:$0xff] }
  0x15   :  { %v456_v36 = vld [vmem:[#allocation6 + $0x10] sm:$0xff]  ;;  %v455_v37 = vld [vmem:[#allocation6 + $0x8] sm:$0xff]  ;;  %v454_v38 = vld [vmem:[#allocation6] sm:$0xff] }
  0x16   :  { %165 = vmatpush.bf16.msra.mxu0 %v443_v4  ;;  %249 = vmatpush.bf16.msra.mxu2 %v443_v4 }
  0x17   :  { %232 = vmatpush.bf16.msra.mxu1 %v451_v5 }
  0x18   :  { %317 = vmatpush.bf16.msra.mxu3 %v460_v27 }
  0x1a   :  { %166 = vmatpush.bf16.msra.mxu0 %v442_v6  ;;  %250 = vmatpush.bf16.msra.mxu2 %v442_v6 }
  0x1b   :  { %233 = vmatpush.bf16.msra.mxu1 %v450_v7 }
  0x1c   :  { %318 = vmatpush.bf16.msra.mxu3 %v459_v28 }
  0x1e   :  { %167 = vmatpush.bf16.msra.mxu0 %v441_v8  ;;  %251 = vmatpush.bf16.msra.mxu2 %v441_v8 }
  0x1f   :  { %234 = vmatpush.bf16.msra.mxu1 %v449_v15 }
  0x20   :  { %319 = vmatpush.bf16.msra.mxu3 %v458_v29 }
  0x22   :  { %168 = vmatpush.bf16.msra.mxu0 %v440_v9  ;;  %252 = vmatpush.bf16.msra.mxu2 %v440_v9 }
  0x23   :  { %235 = vmatpush.bf16.msra.mxu1 %v448_v16 }
  0x24   :  { %320 = vmatpush.bf16.msra.mxu3 %v457_v35 }
  0x26   :  { %169 = vmatpush.bf16.msra.mxu0 %v439_v10  ;;  %253 = vmatpush.bf16.msra.mxu2 %v439_v10 }
  0x27   :  { %236 = vmatpush.bf16.msra.mxu1 %v447_v17 }
  0x28   :  { %321 = vmatpush.bf16.msra.mxu3 %v456_v36 }
  0x2a   :  { %170 = vmatpush.bf16.msra.mxu0 %v438_v11  ;;  %254 = vmatpush.bf16.msra.mxu2 %v438_v11 }
  0x2b   :  { %237 = vmatpush.bf16.msra.mxu1 %v446_v18 }
  0x2c   :  { %322 = vmatpush.bf16.msra.mxu3 %v455_v37 }
  0x2d   :  { %171 = vmatmul.bf16.vlgmr.msra.gmra.mxu0 %v114_v14 }
  0x30   :  { %323 = vmatpush.bf16.msra.mxu3 %v454_v38 }
  0xaa   :  { %v172_v19 = vpop.f32.mrf.mxu0 }
  0xab   :  { %v370_v20 = vadd.f32 -0.1, %v172_v19 }
  0xad   :  { %v179_v23 = vmax.f32 %v370_v20, 0.0 }
  0xb2   :  { %v174_v21 = vpop.f32.mrf.mxu0 }
  0xb3   :  { %v371_v22 = vadd.f32 -0.1, %v174_v21 }
  0xb5   :  { %v180_v24 = vmax.f32 %v371_v22, 0.0 }
  0xb7   :  { %v181_v25 = vpack.c.bf16 %v180_v24, %v179_v23 }
  0xb9   :  { %238 = vmatmul.bf16.vlgmr.msra.gmra.mxu1 %v181_v25 }
 0x136   :  { %v239_v30 = vpop.f32.mrf.mxu1 }
 0x137   :  { %v244_v32 = vsub.f32 %v239_v30, %v112_v12 }
 0x13e   :  { %v241_v31 = vpop.f32.mrf.mxu1 }
 0x13f   :  { %v245_v33 = vsub.f32 %v241_v31, %v113_v13 }
 0x141   :  { %v246_v34 = vpack.c.bf16 %v245_v33, %v244_v32 }
 0x143   :  { %255 = vmatmul.bf16.vlgmr.msra.gmra.mxu2 %v246_v34 }
 0x1c6   :  { %v256_v39 = vpop.f32.mrf.mxu2 }
 0x1c7   :  { %v261_v40 = vsub.f32 %v179_v23, %v256_v39 }
 0x1c9   :  { %v404_v42 = vadd.f32 -0.1, %v261_v40 }
 0x1cb   :  { %v265_v45 = vmax.f32 %v404_v42, 0.0 }
 0x1ce   :  { %v258_v41 = vpop.f32.mrf.mxu2 }
 0x1cf   :  { %v262_v43 = vsub.f32 %v180_v24, %v258_v41 }
 0x1d1   :  { %v405_v44 = vadd.f32 -0.1, %v262_v43 }
 0x1d3   :  { %v266_v46 = vmax.f32 %v405_v44, 0.0 }
 0x1d5   :  { %v267_v47 = vpack.c.bf16 %v266_v46, %v265_v45 }
 0x1d7   :  { %324 = vmatmul.bf16.vlgmr.msra.gmra.mxu3 %v267_v47 }
 0x25a   :  { %v325_v48 = vpop.f32.mrf.mxu3 }
 0x25b   :  { %330 = vst [vmem:[%s598_s4] sm:$0xff] %v325_v48 }
 0x262   :  { %v327_v49 = vpop.f32.mrf.mxu3 }
 0x263   :  { %331 = vst [vmem:[%s598_s4 + $0x8] sm:$0xff] %v327_v49 }
 0x264   :  { %336 = vsyncpa [#allocation3], 1 }
 0x265   :  { %337 = vsyncpa [#allocation5], 1 }

</bundles_post_ra>
